<compile_context>
chip_gen: v6e
topology: v6e:2x2x1
jax: 0.10.0
libtpu: 0.0.40
codegen_flags: <defaults>
</compile_context>

<pallas_src>
import jax
import jax.numpy as jnp
from jax.experimental import pallas as pl
from jax.experimental.pallas import tpu as pltpu


def _round_up(x, m):
    return (x + m - 1) // m * m


def _default_vmem_limit_bytes():
    # v7x has 64 MiB VMEM per TensorCore -> leave headroom for compiler
    # internal scratch; v5e/v6e have 128 MiB -> allow ~100 MiB.
    try:
        cap = pltpu.get_tpu_info().vmem_capacity_bytes
    except Exception:
        cap = 64 * 1024 * 1024
    if cap <= 64 * 1024 * 1024:
        return 52 * 1024 * 1024
    return 100 * 1024 * 1024


def residual_ff_kernel(x_ref, w1_ref, b1_ref, w2_ref, b2_ref, o_ref):
    # x_ref: (TM, Dp) bf16 row tile.  w1/w2 bf16, b1/b2 f32, all resident in
    # VMEM (constant block index across the grid -> weight DMA fires once).
    x = x_ref[...]                                              # bf16 (TM, Dp)
    h = jnp.dot(x, w1_ref[...], preferred_element_type=jnp.float32)
    # TODO(synk): PyTorch nn.GELU() defaults to exact erf; tanh approximation
    # kept here for a cheap EUP lowering (small systematic deviation).
    h = jax.nn.gelu(h + b1_ref[...], approximate=True)          # f32 VPU/EUP
    y = jnp.dot(h.astype(jnp.bfloat16), w2_ref[...],
                preferred_element_type=jnp.float32)
    # Residual.forward semantics: fn(x) + x   (residual add in f32)
    y = y + b2_ref[...] + x.astype(jnp.float32)
    o_ref[...] = y.astype(o_ref.dtype)                          # single cast at store


def prepare_ff_params(w1, b1, w2, b2):
    """One-time lane-dense padding (multiples of 128) + bf16 cast of weights."""
    D, H = w1.shape
    Dp, Hp = _round_up(D, 128), _round_up(H, 128)
    w1p = jnp.pad(w1, ((0, Dp - D), (0, Hp - H))).astype(jnp.bfloat16)
    w2p = jnp.pad(w2, ((0, Hp - H), (0, Dp - D))).astype(jnp.bfloat16)
    b1p = jnp.pad(b1.reshape(1, H), ((0, 0), (0, Hp - H))).astype(jnp.float32)
    b2p = jnp.pad(b2.reshape(1, D), ((0, 0), (0, Dp - D))).astype(jnp.float32)
    return dict(w1=w1p, b1=b1p, w2=w2p, b2=b2p, D=D, H=H, Dp=Dp, Hp=Hp)


def residual_feedforward(x, params, *, tile_m=512, vmem_limit_bytes=None):
    """x: (B, N, D). Returns fn(x) + x (bf16) with fn = Linear->GELU->Linear."""
    B, N, D = x.shape
    assert D == params["D"], "x feature dim must match prepared params"
    Dp, Hp = params["Dp"], params["Hp"]
    M = B * N

    if vmem_limit_bytes is None:
        vmem_limit_bytes = _default_vmem_limit_bytes()

    # --- bf16 activation stream; pad columns only when D is not lane-dense --
    x2 = x.reshape(M, D)
    if x2.dtype != jnp.bfloat16:
        x2 = x2.astype(jnp.bfloat16)
    if Dp != D:
        x2 = jnp.pad(x2, ((0, 0), (0, Dp - D)))

    # --- row tile: multiple of 8, as large as the VMEM budget allows --------
    tm = _round_up(min(tile_m, _round_up(M, 8)), 8)

    def _vmem_bytes(t, x_bufs):
        x_io = x_bufs * t * Dp * 2                     # x tiles (bf16)
        o_io = 2 * t * Dp * 2                          # out tiles (bf16)
        w = 2 * Dp * Hp * 2                            # w1+w2 single-buffered bf16
        b = (Hp + Dp) * 4                              # biases f32
        inter = t * Hp * (4 + 2) + t * Dp * (4 + 4)    # h(f32+bf16), y(f32), x(f32)
        return x_io + o_io + w + b + inter

    budget = int(0.85 * vmem_limit_bytes)              # headroom for internal scratch
    while tm > 8 and _vmem_bytes(tm, 2) > budget:
        tm = _round_up(max(tm // 2, 8), 8)
    x_bufs = 3 if _vmem_bytes(tm, 3) <= budget else 2  # deeper x pipeline if free

    # --- ragged last tile handled in-kernel (masked edge block) -------------
    grid = (pl.cdiv(M, tm),)
    out_shape = jax.ShapeDtypeStruct((M, Dp), jnp.bfloat16)

    def _call(use_pipeline_modes):
        x_kw, w_kw = {}, {}
        if use_pipeline_modes:
            x_kw = dict(pipeline_mode=pl.Buffered(x_bufs))
            w_kw = dict(pipeline_mode=pl.Buffered(1))   # resident weights: 1 buffer
        return pl.pallas_call(
            residual_ff_kernel,
            out_shape=out_shape,
            grid_spec=pltpu.PrefetchScalarGridSpec(
                num_scalar_prefetch=0,
                grid=grid,
                in_specs=[
                    pl.BlockSpec((tm, Dp), lambda i: (i, 0), **x_kw),   # x rows
                    pl.BlockSpec((Dp, Hp), lambda i: (0, 0), **w_kw),   # w1 (DMA once)
                    pl.BlockSpec((1, Hp), lambda i: (0, 0), **w_kw),    # b1
                    pl.BlockSpec((Hp, Dp), lambda i: (0, 0), **w_kw),   # w2
                    pl.BlockSpec((1, Dp), lambda i: (0, 0), **w_kw),    # b2
                ],
                out_specs=pl.BlockSpec((tm, Dp), lambda i: (i, 0)),
            ),
            compiler_params=pltpu.CompilerParams(
                dimension_semantics=("parallel",),      # shards rows across v7x's 2 TCs
                vmem_limit_bytes=vmem_limit_bytes,
            ),
        )(x2, params["w1"], params["b1"], params["w2"], params["b2"])

    try:
        out = _call(True)
    except Exception:
        # Fallback if this JAX build rejects pipeline_mode / Buffered(1).
        out = _call(False)

    if Dp != D:
        out = out[:, :D]
    return out.reshape(B, N, D)


def _reference(x2, w1, b1, w2, b2):
    h = jax.nn.gelu(x2 @ w1 + b1.reshape(1, -1), approximate=True)
    return h @ w2 + b2.reshape(1, -1) + x2


if __name__ == "__main__":
    # Small but lane-aligned demo shapes: batch=2, tokens=8, dim=128, hidden=256.
    B, N, D, H = 2, 8, 128, 256

    key = jax.random.PRNGKey(0)
    kx, kw1, kb1, kw2, kb2 = jax.random.split(key, 5)

    x = jax.random.normal(kx, (B, N, D), dtype=jnp.float32)
    # Deterministic synthetic parameters for fn (FeedForward: D -> H -> D).
    w1 = jax.random.normal(kw1, (D, H), dtype=jnp.float32) * 0.05
    b1 = jax.random.normal(kb1, (1, H), dtype=jnp.float32) * 0.01
    w2 = jax.random.normal(kw2, (H, D), dtype=jnp.float32) * 0.05
    b2 = jax.random.normal(kb2, (1, D), dtype=jnp.float32) * 0.01

    params = prepare_ff_params(w1, b1, w2, b2)      # one-time pad/cast (cached)
    out = residual_feedforward(x, params)
    out = jax.block_until_ready(out)

    ref = _reference(x.reshape(-1, D), w1, b1, w2, b2).reshape(B, N, D)
    assert out.shape == (B, N, D)
    assert out.dtype == jnp.bfloat16
    # bf16 activation stream + bf16 MXU operands (f32 accumulation) -> compare
    # against the f32 reference with a correspondingly loose tolerance.
    assert jnp.allclose(out.astype(jnp.float32), ref, atol=5e-2, rtol=5e-2), \
        "mismatch vs reference"

    print("KERNEL_OK")
</pallas_src>

<mosaic_0001>
module attributes {stable_mosaic.version = 11 : i64} {
  func.func @residual_ff_kernel(%arg0: i32, %arg1: memref<16x128xbf16, #tpu.memory_space<vmem>>, %arg2: memref<128x256xbf16, #tpu.memory_space<vmem>>, %arg3: memref<1x256xf32, #tpu.memory_space<vmem>>, %arg4: memref<256x128xbf16, #tpu.memory_space<vmem>>, %arg5: memref<1x128xf32, #tpu.memory_space<vmem>>, %arg6: memref<16x128xbf16, #tpu.memory_space<vmem>>) attributes {dimension_semantics = [#tpu.dimension_semantics<parallel>], iteration_bounds = array<i64: 1>, scalar_prefetch = 0 : i64, scratch_operands = 0 : i64, tpu.core_type = #tpu.core_type<tc>, window_params = [{transform_indices = @transform_0, window_bounds = array<i64: 16, 128>}, {pipeline_mode = #tpu.pipeline_mode<synchronous>, transform_indices = @transform_1, window_bounds = array<i64: 128, 256>}, {pipeline_mode = #tpu.pipeline_mode<synchronous>, transform_indices = @transform_2, window_bounds = array<i64: 1, 256>}, {pipeline_mode = #tpu.pipeline_mode<synchronous>, transform_indices = @transform_3, window_bounds = array<i64: 256, 128>}, {pipeline_mode = #tpu.pipeline_mode<synchronous>, transform_indices = @transform_4, window_bounds = array<i64: 1, 128>}, {transform_indices = @transform_5, window_bounds = array<i64: 16, 128>}]} {
    %c0 = arith.constant 0 : index
    %c0_0 = arith.constant 0 : index
    %0 = vector.load %arg1[%c0, %c0_0] : memref<16x128xbf16, #tpu.memory_space<vmem>>, vector<16x128xbf16>
    %c0_1 = arith.constant 0 : index
    %c0_2 = arith.constant 0 : index
    %1 = vector.load %arg2[%c0_1, %c0_2] : memref<128x256xbf16, #tpu.memory_space<vmem>>, vector<128x256xbf16>
    %cst = arith.constant dense<0.000000e+00> : vector<16x256xf32>
    %2 = tpu.matmul %0, %1, %cst {dimension_numbers = #tpu.dot_dimension_numbers<[1], [0], [0], [1], [0, 0, 1, 1], [], []>} : vector<16x128xbf16>, vector<128x256xbf16>, vector<16x256xf32> -> vector<16x256xf32>
    %c0_3 = arith.constant 0 : index
    %c0_4 = arith.constant 0 : index
    %3 = vector.load %arg3[%c0_3, %c0_4] : memref<1x256xf32, #tpu.memory_space<vmem>>, vector<1x256xf32>
    %4 = vector.broadcast %3 : vector<1x256xf32> to vector<16x256xf32>
    %5 = arith.addf %2, %4 : vector<16x256xf32>
    %6 = arith.mulf %5, %5 : vector<16x256xf32>
    %7 = arith.mulf %5, %6 : vector<16x256xf32>
    %cst_5 = arith.constant 4.471500e-02 : f32
    %8 = vector.broadcast %cst_5 : f32 to vector<16x256xf32>
    %9 = arith.mulf %8, %7 : vector<16x256xf32>
    %10 = arith.addf %5, %9 : vector<16x256xf32>
    %cst_6 = arith.constant 0.797884583 : f32
    %11 = vector.broadcast %cst_6 : f32 to vector<16x256xf32>
    %12 = arith.mulf %11, %10 : vector<16x256xf32>
    %13 = math.tanh %12 : vector<16x256xf32>
    %cst_7 = arith.constant 1.000000e+00 : f32
    %14 = vector.broadcast %cst_7 : f32 to vector<16x256xf32>
    %15 = arith.addf %14, %13 : vector<16x256xf32>
    %cst_8 = arith.constant 5.000000e-01 : f32
    %16 = vector.broadcast %cst_8 : f32 to vector<16x256xf32>
    %17 = arith.mulf %16, %15 : vector<16x256xf32>
    %18 = arith.mulf %5, %17 : vector<16x256xf32>
    %19 = arith.truncf %18 : vector<16x256xf32> to vector<16x256xbf16>
    %c0_9 = arith.constant 0 : index
    %c0_10 = arith.constant 0 : index
    %20 = vector.load %arg4[%c0_9, %c0_10] : memref<256x128xbf16, #tpu.memory_space<vmem>>, vector<256x128xbf16>
    %cst_11 = arith.constant dense<0.000000e+00> : vector<16x128xf32>
    %21 = tpu.matmul %19, %20, %cst_11 {dimension_numbers = #tpu.dot_dimension_numbers<[1], [0], [0], [1], [0, 0, 1, 1], [], []>} : vector<16x256xbf16>, vector<256x128xbf16>, vector<16x128xf32> -> vector<16x128xf32>
    %c0_12 = arith.constant 0 : index
    %c0_13 = arith.constant 0 : index
    %22 = vector.load %arg5[%c0_12, %c0_13] : memref<1x128xf32, #tpu.memory_space<vmem>>, vector<1x128xf32>
    %23 = vector.broadcast %22 : vector<1x128xf32> to vector<16x128xf32>
    %24 = arith.addf %21, %23 : vector<16x128xf32>
    %25 = arith.extf %0 : vector<16x128xbf16> to vector<16x128xf32>
    %26 = arith.addf %24, %25 : vector<16x128xf32>
    %27 = arith.truncf %26 : vector<16x128xf32> to vector<16x128xbf16>
    %c0_14 = arith.constant 0 : index
    %c0_15 = arith.constant 0 : index
    %28 = vector.load %arg6[%c0_14, %c0_15] : memref<16x128xbf16, #tpu.memory_space<vmem>>, vector<16x128xbf16>
    tpu.vector_store %arg6[%c0_14, %c0_15], %27 {strides = array<i32>} : memref<16x128xbf16, #tpu.memory_space<vmem>>, vector<16x128xbf16>,
    return
  }
  func.func @transform_0(%arg0: i32) -> (i32, i32) {
    %c0_i32 = arith.constant 0 : i32
    %c0_i32_0 = arith.constant 0 : i32
    return %arg0, %c0_i32 : i32, i32
  }
  func.func @transform_1(%arg0: i32) -> (i32, i32) {
    %c0_i32 = arith.constant 0 : i32
    %c0_i32_0 = arith.constant 0 : i32
    %c0_i32_1 = arith.constant 0 : i32
    return %c0_i32, %c0_i32_0 : i32, i32
  }
  func.func @transform_2(%arg0: i32) -> (i32, i32) {
    %c0_i32 = arith.constant 0 : i32
    %c0_i32_0 = arith.constant 0 : i32
    %c0_i32_1 = arith.constant 0 : i32
    return %c0_i32, %c0_i32_0 : i32, i32
  }
  func.func @transform_3(%arg0: i32) -> (i32, i32) {
    %c0_i32 = arith.constant 0 : i32
    %c0_i32_0 = arith.constant 0 : i32
    %c0_i32_1 = arith.constant 0 : i32
    return %c0_i32, %c0_i32_0 : i32, i32
  }
  func.func @transform_4(%arg0: i32) -> (i32, i32) {
    %c0_i32 = arith.constant 0 : i32
    %c0_i32_0 = arith.constant 0 : i32
    %c0_i32_1 = arith.constant 0 : i32
    return %c0_i32, %c0_i32_0 : i32, i32
  }
  func.func @transform_5(%arg0: i32) -> (i32, i32) {
    %c0_i32 = arith.constant 0 : i32
    %c0_i32_0 = arith.constant 0 : i32
    return %arg0, %c0_i32 : i32, i32
  }
}

</mosaic_0001>

<bundles_post_ra>
// kernel: tpu_custom_call.1
= control target key start
LH: loop header
LB: loop body
LE: loop exit
PB: predicated region body
PF: predicated region fallthrough
CT: control target
= control target key end

     0   :  { %10 = vsyncpa [#allocation3], 0  ;;  %s749_s0 = inlined_call_operand.hbm [shape: bf16[16,128], index: 0, kind: input, shape index: {}]   ;;  %s750_s1 = inlined_call_operand.hbm [shape: bf16[128,256], index: 1, kind: input, shape index: {}]   ;;  %s751_s2 = inlined_call_operand.vmem [shape: f32[1,256], index: 2, kind: input, shape index: {}]   ;;  %s752_s3 = inlined_call_operand.hbm [shape: bf16[256,128], index: 3, kind: input, shape index: {}]   ;;  %s753_s4 = inlined_call_operand.vmem [shape: f32[1,128], index: 4, kind: input, shape index: {}]   ;;  %s754_s5 = inlined_call_operand.hbm [shape: bf16[16,128], index: 5, kind: output, shape index: {}]  }
   0x1   :  { %11 = vsyncpa [#allocation6], 0 }
   0x2   :  { %12 = vsyncpa [#allocation4], 0  ;;  %s678_s18 = smov [#allocation5]  }
   0x3   :  { %s30_s19 = sshll.u32 %s678_s18, 4  ;;  %s31_s19 = int_to_ptr.vmem [resolvable:$true] %s30_s19 }
   0x4   :  { %s600_s20 = scalar_lea.vmem %s31_s19, 2048  ;;  %p605_p1 = scmp.lt.s32.totalorder %s31_s19, %s31_s19 }
   0x5   :  { %p601_p0 = scmp.ne.s32.totalorder %s31_s19, %s600_s20  ;;  %p606_p2 = scmp.lt.s32.totalorder %s600_s20, %s600_s20 }
   0x7   :  { %p607_p3 = por %p606_p2, %p605_p1 }
   0x9   :  { %p608_p4 = pnand %p607_p3, %p601_p0 }
   0xb   :  { %611 = shalt.err (!%p608_p4)
}
   0xc   :  { %s679_s21 = smov 128   ;;  %s680_s22 = smov 8  }
   0xd   :  { %36 = dma.hbm_to_vmem [thread:$0]  %s750_s1, 2048, %s31_s19, [#allocation6], %s679_s21, %s679_s21, %s680_s22  }
   0xe   :  { %s681_s25 = smov [#allocation2]  }
   0xf   :  { %s18_s26 = sshll.u32 %s681_s25, 4  ;;  %s19_s26 = int_to_ptr.vmem [resolvable:$true] %s18_s26 }
  0x10   :  { %s620_s27 = scalar_lea.vmem %s19_s26, 128  ;;  %p625_p6 = scmp.lt.s32.totalorder %s19_s26, %s19_s26 }
  0x11   :  { %p621_p5 = scmp.ne.s32.totalorder %s19_s26, %s620_s27  ;;  %p626_p7 = scmp.lt.s32.totalorder %s620_s27, %s620_s27 }
  0x13   :  { %p627_p8 = por %p626_p7, %p625_p6 }
  0x15   :  { %p628_p9 = pnand %p627_p8, %p621_p5 }
  0x17   :  { %631 = shalt.err (!%p628_p9)
}
  0x18   :  { %s682_s28 = smov 64   ;;  %s683_s29 = smov 4  }
  0x19   :  { %24 = dma.hbm_to_vmem [thread:$0]  %s749_s0, 128, %s19_s26, [#allocation3], %s682_s28, %s682_s28, %s683_s29  }
  0x1a   :  { %s684_s1 = smov [#allocation7]  }
  0x1b   :  { %s44_s7 = sshll.u32 %s684_s1, 4  ;;  %s45_s7 = int_to_ptr.vmem [resolvable:$true] %s44_s7 }
  0x1c   :  { %s640_s8 = scalar_lea.vmem %s45_s7, 2048  ;;  %p645_p11 = scmp.lt.s32.totalorder %s45_s7, %s45_s7 }
  0x1d   :  { %p641_p10 = scmp.ne.s32.totalorder %s45_s7, %s640_s8  ;;  %p646_p12 = scmp.lt.s32.totalorder %s640_s8, %s640_s8 }
  0x1f   :  { %p647_p13 = por %p646_p12, %p645_p11 }
  0x21   :  { %p648_p0 = pnand %p647_p13, %p641_p10 }
  0x23   :  { %651 = shalt.err (!%p648_p0)
}
  0x24   :  { %50 = dma.hbm_to_vmem [thread:$0]  %s752_s3, 2048, %s45_s7, [#allocation6], %s682_s28, %s682_s28, %s683_s29  }
  0x25   :  { %672 = dma.done.wait [#allocation3], 128  }
  0x26   :  { %673 = vsyncadd [#allocation3], 4294967168 }
  0x27   :  { %674 = dma.done.wait [#allocation6], 4096  }
  0x28   :  { %675 = vsyncadd [#allocation6], 4294963200  ;;  %v685_v0 = vmov 0   ;;  %v542_v1 = vld [vmem:[#allocation5 + $0x74] ss:$8 sps:$4 sm:$0xff]   ;;  %v571_v22 = vld [vmem:[#allocation7 + $0x68] sm:$0xff]   ;;  %v83_v34 = vlaneseq }
  0x29   :  { %211 = vmatprep.mubr.bf16.mxu0 %v685_v0  ;;  %v544_v2 = vld [vmem:[#allocation5 + $0x70] ss:$8 sps:$4 sm:$0xff]   ;;  %179 = vmatprep.subr.bf16.mxu0 %v542_v1  ;;  %v545_v3 = vld [vmem:[#allocation5 + $0x64] ss:$8 sps:$4 sm:$0xff]   ;;  %v547_v4 = vld [vmem:[#allocation5 + $0x60] ss:$8 sps:$4 sm:$0xff]  }
  0x2a   :  { %180 = vmatpush1.bf16.msra.mxu0 %v544_v2  ;;  %v548_v5 = vld [vmem:[#allocation5 + $0x54] ss:$8 sps:$4 sm:$0xff]   ;;  %v550_v6 = vld [vmem:[#allocation5 + $0x50] ss:$8 sps:$4 sm:$0xff]   ;;  %v551_v7 = vld [vmem:[#allocation5 + $0x44] ss:$8 sps:$4 sm:$0xff]  }
  0x2b   :  { %181 = vmatprep.subr.bf16.mxu0 %v545_v3  ;;  %v553_v8 = vld [vmem:[#allocation5 + $0x40] ss:$8 sps:$4 sm:$0xff]   ;;  %v554_v9 = vld [vmem:[#allocation5 + $0x34] ss:$8 sps:$4 sm:$0xff]   ;;  %v556_v10 = vld [vmem:[#allocation5 + $0x30] ss:$8 sps:$4 sm:$0xff]  }
  0x2c   :  { %v557_v11 = vld [vmem:[#allocation5 + $0x24] ss:$8 sps:$4 sm:$0xff]   ;;  %v559_v12 = vld [vmem:[#allocation5 + $0x20] ss:$8 sps:$4 sm:$0xff]   ;;  %v560_v13 = vld [vmem:[#allocation5 + $0x14] ss:$8 sps:$4 sm:$0xff]  }
  0x2d   :  { %v562_v14 = vld [vmem:[#allocation5 + $0x10] ss:$8 sps:$4 sm:$0xff]   ;;  %v563_v15 = vld [vmem:[#allocation5 + $0x4] ss:$8 sps:$4 sm:$0xff]   ;;  %v565_v16 = vld [vmem:[#allocation5] ss:$8 sps:$4 sm:$0xff]  }
  0x2e   :  { %182 = vmatpush1.bf16.msra.mxu0 %v547_v4  ;;  %v732_v17 = vld [vmem:[#allocation2] sm:$0xff]   ;;  %v569_v20 = vld [vmem:[#allocation7 + $0x70] sm:$0xff]   ;;  %v572_v23 = vld [vmem:[#allocation7 + $0x28] sm:$0xff]   ;;  %v84_v35 = vshrl.u32 %v83_v34, 7  ;;  %s686_s12 = smov [#allocation8]  }
  0x2f   :  { %183 = vmatprep.subr.bf16.mxu0 %v548_v5  ;;  %v567_v18 = vld [vmem:[#allocation7 + $0x78] sm:$0xff]   ;;  %v570_v21 = vld [vmem:[#allocation7 + $0x30] sm:$0xff]   ;;  %v573_v24 = vld [vmem:[#allocation7 + $0x60] sm:$0xff]   ;;  %s455_s13 = sshll.u32 %s686_s12, 4  ;;  %s456_s13 = int_to_ptr.vmem [resolvable:$true] %s455_s13 }
  0x30   :  { %v568_v19 = vld [vmem:[#allocation7 + $0x38] sm:$0xff]   ;;  %511 = vmatprep.subr.bf16.mxu1 %v567_v18  ;;  %v574_v25 = vld [vmem:[#allocation7 + $0x20] sm:$0xff]   ;;  %v577_v28 = vld [vmem:[#allocation7 + $0x50] sm:$0xff]   ;;  %v85_v36 = vsub.s32 0, %v84_v35  ;;  %v89_v38 = vsub.s32 1, %v84_v35  ;;  %s652_s14 = scalar_lea.vmem %s456_s13, 128  ;;  %p657_p2 = scmp.lt.s32.totalorder %s456_s13, %s456_s13 }
  0x31   :  { %512 = vmatpush3.bf16.msra.mxu1 %v568_v19  ;;  %v575_v26 = vld [vmem:[#allocation7 + $0x58] sm:$0xff]   ;;  %v578_v29 = vld [vmem:[#allocation7 + $0x10] sm:$0xff]   ;;  %v579_v30 = vld [vmem:[#allocation7 + $0x48] sm:$0xff]   ;;  %p653_p1 = scmp.ne.s32.totalorder %s456_s13, %s652_s14  ;;  %p658_p3 = scmp.lt.s32.totalorder %s652_s14, %s652_s14 }
  0x32   :  { %184 = vmatpush1.bf16.msra.mxu0 %v550_v6  ;;  %513 = vmatprep.subr.bf16.mxu1 %v569_v20  ;;  %v576_v27 = vld [vmem:[#allocation7 + $0x18] sm:$0xff]   ;;  %v580_v31 = vld [vmem:[#allocation7 + $0x8] sm:$0xff]   ;;  %v581_v32 = vld [vmem:[#allocation7 + $0x40] sm:$0xff]  }
  0x33   :  { %185 = vmatprep.subr.bf16.mxu0 %v551_v7  ;;  %v582_v33 = vld [vmem:[#allocation7] sm:$0xff]   ;;  %v81_v37 = vld [vmem:[%s751_s2] sm:$0x3]  ;;  %p659_p4 = por %p658_p3, %p657_p2 }
  0x34   :  { %v86_v39 = vrot.slane %v81_v37, %v85_v36  ;;  %v90_v40 = vrot.slane %v81_v37, %v89_v38 }
  0x35   :  { %514 = vmatpush3.bf16.msra.mxu1 %v570_v21  ;;  %p660_p5 = pnand %p659_p4, %p653_p1 }
  0x36   :  { %186 = vmatpush1.bf16.msra.mxu0 %v553_v8  ;;  %515 = vmatprep.subr.bf16.mxu1 %v571_v22 }
  0x37   :  { %187 = vmatprep.subr.bf16.mxu0 %v554_v9 }
  0x39   :  { %516 = vmatpush3.bf16.msra.mxu1 %v572_v23 }
  0x3a   :  { %188 = vmatpush1.bf16.msra.mxu0 %v556_v10  ;;  %517 = vmatprep.subr.bf16.mxu1 %v573_v24 }
  0x3b   :  { %189 = vmatprep.subr.bf16.mxu0 %v557_v11 }
  0x3d   :  { %518 = vmatpush3.bf16.msra.mxu1 %v574_v25 }
  0x3e   :  { %190 = vmatpush1.bf16.msra.mxu0 %v559_v12  ;;  %519 = vmatprep.subr.bf16.mxu1 %v575_v26 }
  0x3f   :  { %191 = vmatprep.subr.bf16.mxu0 %v560_v13 }
  0x41   :  { %520 = vmatpush3.bf16.msra.mxu1 %v576_v27  ;;  %v485_v27 = vld [vmem:[%s753_s4] ss:$0 sm:$0xff] }
  0x42   :  { %192 = vmatpush1.bf16.msra.mxu0 %v562_v14  ;;  %521 = vmatprep.subr.bf16.mxu1 %v577_v28 }
  0x43   :  { %193 = vmatprep.subr.bf16.mxu0 %v563_v15 }
  0x45   :  { %522 = vmatpush3.bf16.msra.mxu1 %v578_v29 }
  0x46   :  { %194 = vmatpush1.bf16.msra.mxu0 %v565_v16  ;;  %523 = vmatprep.subr.bf16.mxu1 %v579_v30  ;;  %v436_v30 = vunpack.c.l.bf16 %v732_v17 }
  0x49   :  { %212 = vmatmul.mubr.bf16.vlgmr.msra.gmra.mxu0 %v732_v17  ;;  %524 = vmatpush3.bf16.msra.mxu1 %v580_v31  ;;  %v437_v31 = vunpack.c.h.bf16 %v732_v17 }
  0x4a   :  { %525 = vmatprep.subr.bf16.mxu1 %v581_v32 }
  0x4d   :  { %526 = vmatpush3.bf16.msra.mxu1 %v582_v33 }
 0x109   :  { %v213_v41 = vpop.f32.mrf.mxu0 }
 0x10a   :  { %v214_v42 = vadd.f32 %v213_v41, %v86_v39 }
 0x10b   :  { %v215_v43 = vpop.f32.mrf.mxu0 }
 0x10c   :  { %v222_v44 = vmul.f32 %v214_v42, %v214_v42  ;;  %v216_v45 = vadd.f32 %v215_v43, %v90_v40 }
 0x10d   :  { %v217_v46 = vpop.f32.mrf.mxu0 }
 0x10e   :  { %v226_v47 = vmul.f32 %v222_v44, %v214_v42  ;;  %v223_v48 = vmul.f32 %v216_v45, %v216_v45  ;;  %v218_v49 = vadd.f32 %v217_v46, %v86_v39 }
 0x10f   :  { %v219_v50 = vpop.f32.mrf.mxu0 }
 0x110   :  { %v230_v51 = vmul.f32 0.044715, %v226_v47  ;;  %v227_v52 = vmul.f32 %v223_v48, %v216_v45  ;;  %v224_v53 = vmul.f32 %v218_v49, %v218_v49  ;;  %v220_v54 = vadd.f32 %v219_v50, %v90_v40 }
 0x112   :  { %v234_v55 = vadd.f32 %v230_v51, %v214_v42  ;;  %v231_v56 = vmul.f32 0.044715, %v227_v52  ;;  %v228_v57 = vmul.f32 %v224_v53, %v218_v49  ;;  %v225_v58 = vmul.f32 %v220_v54, %v220_v54 }
 0x114   :  { %v238_v59 = vmul.f32 0.7978846, %v234_v55  ;;  %v235_v60 = vadd.f32 %v231_v56, %v216_v45  ;;  %v232_v61 = vmul.f32 0.044715, %v228_v57  ;;  %v229_v62 = vmul.f32 %v225_v58, %v220_v54 }
 0x116   :  { %v236_v63 = vadd.f32 %v232_v61, %v218_v49  ;;  %v233_v0 = vmul.f32 0.044715, %v229_v62  ;;  %v239_v1 = vmul.f32 0.7978846, %v235_v60  ;;  %584 = vtanh.f32 %v238_v59 }
 0x118   :  { %v240_v2 = vmul.f32 0.7978846, %v236_v63  ;;  %v237_v3 = vadd.f32 %v233_v0, %v220_v54  ;;  %586 = vtanh.f32 %v239_v1 }
 0x11a   :  { %588 = vtanh.f32 %v240_v2  ;;  %v241_v4 = vmul.f32 0.7978846, %v237_v3 }
 0x11c   :  { %590 = vtanh.f32 %v241_v4 }
 0x123   :  { %v585_v5 = vpop.eup %584 }
 0x124   :  { %v246_v9 = vadd.f32 1.0, %v585_v5 }
 0x125   :  { %v587_v6 = vpop.eup %586 }
 0x126   :  { %v247_v7 = vadd.f32 1.0, %v587_v6  ;;  %v250_v15 = vmul.f32 0.5, %v246_v9 }
 0x127   :  { %v589_v8 = vpop.eup %588 }
 0x128   :  { %v248_v10 = vadd.f32 1.0, %v589_v8  ;;  %v251_v13 = vmul.f32 0.5, %v247_v7  ;;  %v254_v21 = vmul.f32 %v250_v15, %v214_v42 }
 0x129   :  { %v591_v11 = vpop.eup %590 }
 0x12a   :  { %v249_v12 = vadd.f32 1.0, %v591_v11  ;;  %v252_v14 = vmul.f32 0.5, %v248_v10  ;;  %v255_v19 = vmul.f32 %v251_v13, %v216_v45 }
 0x12c   :  { %v253_v16 = vmul.f32 0.5, %v249_v12  ;;  %v256_v18 = vmul.f32 %v252_v14, %v218_v49 }
 0x12e   :  { %v257_v20 = vmul.f32 %v253_v16, %v220_v54  ;;  %v258_v23 = vpack.c.bf16 %v256_v18, %v254_v21 }
 0x130   :  { %v259_v22 = vpack.c.bf16 %v257_v20, %v255_v19 }
 0x132   :  { %427 = vmatprep.mubr.bf16.mxu1 %v259_v22 }
 0x133   :  { %428 = vmatmul.mubr.bf16.vlgmr.msra.gmra.mxu1 %v258_v23 }
 0x1f3   :  { %v527_v24 = vpop.f32.mrf.mxu1 }
 0x1f5   :  { %v528_v25 = vpop.f32.mrf.mxu1 }
 0x1f6   :  { %v529_v26 = vadd.f32 %v528_v25, %v527_v24 }
 0x1f7   :  { %v530_v28 = vpop.f32.mrf.mxu1 }
 0x1f8   :  { %v430_v32 = vadd.f32 %v529_v26, %v485_v27 }
 0x1f9   :  { %v531_v29 = vpop.f32.mrf.mxu1 }
 0x1fa   :  { %v532_v33 = vadd.f32 %v531_v29, %v530_v28  ;;  %v438_v35 = vadd.f32 %v436_v30, %v430_v32 }
 0x1fc   :  { %v433_v34 = vadd.f32 %v532_v33, %v485_v27 }
 0x1fe   :  { %v439_v36 = vadd.f32 %v437_v31, %v433_v34 }
 0x200   :  { %v509_v37 = vpack.c.bf16 %v439_v36, %v438_v35 }
 0x202   :  { %510 = vst [vmem:[#allocation8] sm:$0xff] %v509_v37  }
 0x203   :  { %663 = shalt.err (!%p660_p5)
}
 0x204   :  { %461 = dma.vmem_to_hbm [thread:$0]  %s456_s13, 128, %s754_s5, [#allocation4], %s682_s28, %s682_s28, %s683_s29  }
 0x205   :  { %676 = dma.done.wait [#allocation4], 128  }
 0x206   :  { %677 = vsyncadd [#allocation4], 4294967168 }
 0x207   :  { %465 = vsyncpa [#allocation3], 1 }
 0x208   :  { %466 = vsyncpa [#allocation6], 1 }
 0x209   :  { %467 = vsyncpa [#allocation4], 1 }

</bundles_post_ra>
